<compile_context>
chip_gen: v6e
topology: v6e:2x2x1
jax: 0.10.0
libtpu: 0.0.40
codegen_flags: <defaults>
</compile_context>

<pallas_src>
import math
import functools

import jax
import jax.numpy as jnp
from jax.experimental import pallas as pl
from jax.experimental.pallas import tpu as pltpu


def _round_up(x, m):
    return ((x + m - 1) // m) * m


def _pick_tile(dim_pad, preferred):
    """Largest power-of-two tile <= preferred that divides dim_pad (>=128)."""
    t = preferred
    while dim_pad % t != 0:
        t //= 2
    return t


def _matmul_kernel(a_ref, b_ref, o_ref, acc_ref, *, apply_relu):
    """One (i, j, k) grid step of o = [relu](a @ b) with f32 accumulation."""
    @pl.when(pl.program_id(2) == 0)
    def _():
        acc_ref[...] = jnp.zeros_like(acc_ref)

    acc_ref[...] += jnp.dot(
        a_ref[...], b_ref[...], preferred_element_type=jnp.float32
    )

    @pl.when(pl.program_id(2) == pl.num_programs(2) - 1)
    def _():
        res = acc_ref[...]
        if apply_relu:
            # ReLU only in the finalize branch -- never clip partial sums.
            res = jnp.maximum(res, 0.0)
        o_ref[...] = res.astype(o_ref.dtype)


def _tiled_matmul(a, b, *, tm, tk, tn, apply_relu, out_dtype=jnp.float32):
    """o = [relu](a @ b); a: [M, K], b: [K, N]; all dims tile-divisible."""
    m, k = a.shape
    _, n = b.shape
    assert m % tm == 0 and k % tk == 0 and n % tn == 0

    cost = pl.CostEstimate(
        flops=2 * m * k * n,
        transcendentals=0,
        bytes_accessed=(
            a.size * a.dtype.itemsize
            + b.size * b.dtype.itemsize
            + m * n * jnp.dtype(out_dtype).itemsize
        ),
    )

    kernel = functools.partial(_matmul_kernel, apply_relu=apply_relu)
    return pl.pallas_call(
        kernel,
        out_shape=jax.ShapeDtypeStruct((m, n), out_dtype),
        grid_spec=pltpu.PrefetchScalarGridSpec(
            num_scalar_prefetch=0,
            grid=(m // tm, n // tn, k // tk),  # reduction axis last
            in_specs=[
                pl.BlockSpec((tm, tk), lambda i, j, kk: (i, kk)),
                pl.BlockSpec((tk, tn), lambda i, j, kk: (kk, j)),
            ],
            out_specs=pl.BlockSpec((tm, tn), lambda i, j, kk: (i, j)),
            scratch_shapes=[pltpu.VMEM((tm, tn), jnp.float32)],
        ),
        compiler_params=pltpu.CompilerParams(
            dimension_semantics=("parallel", "parallel", "arbitrary"),
        ),
        cost_estimate=cost,
    )(a, b)


@functools.partial(jax.jit, static_argnames=("use_bf16",))
def graph_convolution(x, weight, adj, *, use_bf16=False):
    """Fused GCN layer: relu(adj @ (dropout(x) @ W)), eval-mode dropout.

    x:      [N, F_in]     float32
    weight: [F_in, F_out] float32
    adj:    [N, N]        float32
    returns [N, F_out]    float32
    """
    n, f_in = x.shape
    f_out = weight.shape[1]

    # Pad every matmul dim to a multiple of 128 (lane-dense stores, full-width
    # MXU tiles). Zero padding is exact for this computation.
    n_pad = _round_up(n, 128)
    f_in_pad = _round_up(f_in, 128)
    f_out_pad = _round_up(f_out, 128)

    x_p = jnp.pad(x, ((0, n_pad - n), (0, f_in_pad - f_in)))
    w_p = jnp.pad(weight, ((0, f_in_pad - f_in), (0, f_out_pad - f_out)))
    adj_p = jnp.pad(adj, ((0, n_pad - n), (0, n_pad - n)))

    op_dtype = jnp.bfloat16 if use_bf16 else jnp.float32
    x_p = x_p.astype(op_dtype)
    w_p = w_p.astype(op_dtype)
    adj_p = adj_p.astype(op_dtype)

    # 256-aligned tiles where possible (128 otherwise). Double-buffered
    # working set stays ~1-2 MiB -> fits every generation's scoped VMEM.
    tm = _pick_tile(n_pad, 256)
    tk_n = _pick_tile(n_pad, 256)
    tk_f = _pick_tile(f_in_pad, 256)
    tn = _pick_tile(f_out_pad, 256)

    # (1) support = x @ W  -- staged once ([N, F_out] is small).
    support = _tiled_matmul(
        x_p, w_p, tm=tm, tk=tk_f, tn=tn,
        apply_relu=False, out_dtype=op_dtype,
    )

    # (2) out = relu(adj @ support) -- dominant N^2*F_out matmul, tiled reduction.
    out_p = _tiled_matmul(
        adj_p, support, tm=tm, tk=tk_n, tn=tn,
        apply_relu=True, out_dtype=jnp.float32,
    )

    return out_p[:n, :f_out]


def init_weight(key, in_features, out_features):
    # Matches GraphConvolution.reset_parameters: U(-stdv, stdv),
    # stdv = sqrt(6 / (in_features + out_features))
    stdv = math.sqrt(6.0 / (in_features + out_features))
    return jax.random.uniform(
        key, (in_features, out_features), jnp.float32, minval=-stdv, maxval=stdv
    )


if __name__ == "__main__":
    key = jax.random.PRNGKey(0)
    k_x, k_adj, k_w = jax.random.split(key, 3)

    N = 64       # number of graph nodes
    F_IN = 32    # in_features
    F_OUT = 16   # out_features

    x = jax.random.normal(k_x, (N, F_IN), jnp.float32)

    # Symmetric, row-normalized adjacency (typical GCN input).
    a = jax.random.uniform(k_adj, (N, N), jnp.float32)
    a = (a + a.T) * 0.5 + jnp.eye(N, dtype=jnp.float32)
    adj = a / jnp.sum(a, axis=1, keepdims=True)

    weight = init_weight(k_w, F_IN, F_OUT)

    out = graph_convolution(x, weight, adj)
    out = jax.block_until_ready(out)

    # Sanity check against plain-JAX reference (f32 path).
    ref = jnp.maximum(adj @ (x @ weight), 0.0)
    assert out.shape == (N, F_OUT)
    assert jnp.allclose(out, ref, atol=1e-5, rtol=1e-5)

    print("KERNEL_OK")
</pallas_src>

<mosaic_0001>
module attributes {stable_mosaic.version = 11 : i64} {
  func.func @_matmul_kernel(%arg0: i32, %arg1: i32, %arg2: i32, %arg3: memref<128x128xf32, #tpu.memory_space<vmem>>, %arg4: memref<128x128xf32, #tpu.memory_space<vmem>>, %arg5: memref<128x128xf32, #tpu.memory_space<vmem>>, %arg6: memref<128x128xf32, #tpu.memory_space<vmem>>) attributes {dimension_semantics = [#tpu.dimension_semantics<parallel>, #tpu.dimension_semantics<parallel>, #tpu.dimension_semantics<arbitrary>], iteration_bounds = array<i64: 1, 1, 1>, scalar_prefetch = 0 : i64, scratch_operands = 1 : i64, tpu.core_type = #tpu.core_type<tc>, window_params = [{transform_indices = @transform_0, window_bounds = array<i64: 128, 128>}, {transform_indices = @transform_1, window_bounds = array<i64: 128, 128>}, {transform_indices = @transform_2, window_bounds = array<i64: 128, 128>}]} {
    %c0_i32 = arith.constant 0 : i32
    %0 = arith.cmpi eq, %arg2, %c0_i32 : i32
    %1 = arith.extui %0 : i1 to i32
    %c0_i32_0 = arith.constant 0 : i32
    %2 = arith.cmpi ne, %1, %c0_i32_0 : i32
    scf.if %2 {
      %cst_10 = arith.constant 0.000000e+00 : f32
      %12 = vector.broadcast %cst_10 : f32 to vector<128x128xf32>
      %c0_11 = arith.constant 0 : index
      %c0_12 = arith.constant 0 : index
      %13 = vector.load %arg6[%c0_11, %c0_12] : memref<128x128xf32, #tpu.memory_space<vmem>>, vector<128x128xf32>
      tpu.vector_store %arg6[%c0_11, %c0_12], %12 {strides = array<i32>} : memref<128x128xf32, #tpu.memory_space<vmem>>, vector<128x128xf32>,
    } else {
    }
    %c0 = arith.constant 0 : index
    %c0_1 = arith.constant 0 : index
    %3 = vector.load %arg6[%c0, %c0_1] : memref<128x128xf32, #tpu.memory_space<vmem>>, vector<128x128xf32>
    %c0_2 = arith.constant 0 : index
    %c0_3 = arith.constant 0 : index
    %4 = vector.load %arg3[%c0_2, %c0_3] : memref<128x128xf32, #tpu.memory_space<vmem>>, vector<128x128xf32>
    %c0_4 = arith.constant 0 : index
    %c0_5 = arith.constant 0 : index
    %5 = vector.load %arg4[%c0_4, %c0_5] : memref<128x128xf32, #tpu.memory_space<vmem>>, vector<128x128xf32>
    %cst = arith.constant dense<0.000000e+00> : vector<128x128xf32>
    %6 = tpu.matmul %4, %5, %cst {dimension_numbers = #tpu.dot_dimension_numbers<[1], [0], [0], [1], [0, 0, 1, 1], [], []>} : vector<128x128xf32>, vector<128x128xf32>, vector<128x128xf32> -> vector<128x128xf32>
    %7 = arith.addf %3, %6 : vector<128x128xf32>
    %c0_6 = arith.constant 0 : index
    %c0_7 = arith.constant 0 : index
    %8 = vector.load %arg6[%c0_6, %c0_7] : memref<128x128xf32, #tpu.memory_space<vmem>>, vector<128x128xf32>
    tpu.vector_store %arg6[%c0_6, %c0_7], %7 {strides = array<i32>} : memref<128x128xf32, #tpu.memory_space<vmem>>, vector<128x128xf32>,
    %c0_i32_8 = arith.constant 0 : i32
    %9 = arith.cmpi eq, %arg2, %c0_i32_8 : i32
    %10 = arith.extui %9 : i1 to i32
    %c0_i32_9 = arith.constant 0 : i32
    %11 = arith.cmpi ne, %10, %c0_i32_9 : i32
    scf.if %11 {
      %c0_10 = arith.constant 0 : index
      %c0_11 = arith.constant 0 : index
      %12 = vector.load %arg6[%c0_10, %c0_11] : memref<128x128xf32, #tpu.memory_space<vmem>>, vector<128x128xf32>
      %c0_12 = arith.constant 0 : index
      %c0_13 = arith.constant 0 : index
      %13 = vector.load %arg5[%c0_12, %c0_13] : memref<128x128xf32, #tpu.memory_space<vmem>>, vector<128x128xf32>
      tpu.vector_store %arg5[%c0_12, %c0_13], %12 {strides = array<i32>} : memref<128x128xf32, #tpu.memory_space<vmem>>, vector<128x128xf32>,
    } else {
    }
    return
  }
  func.func @transform_0(%arg0: i32, %arg1: i32, %arg2: i32) -> (i32, i32) {
    %c0_i32 = arith.constant 0 : i32
    return %arg0, %arg2 : i32, i32
  }
  func.func @transform_1(%arg0: i32, %arg1: i32, %arg2: i32) -> (i32, i32) {
    %c0_i32 = arith.constant 0 : i32
    return %arg2, %arg1 : i32, i32
  }
  func.func @transform_2(%arg0: i32, %arg1: i32, %arg2: i32) -> (i32, i32) {
    %c0_i32 = arith.constant 0 : i32
    return %arg0, %arg1 : i32, i32
  }
}

module attributes {stable_mosaic.version = 11 : i64} {
  func.func @_matmul_kernel(%arg0: i32, %arg1: i32, %arg2: i32, %arg3: memref<128x128xf32, #tpu.memory_space<vmem>>, %arg4: memref<128x128xf32, #tpu.memory_space<vmem>>, %arg5: memref<128x128xf32, #tpu.memory_space<vmem>>, %arg6: memref<128x128xf32, #tpu.memory_space<vmem>>) attributes {dimension_semantics = [#tpu.dimension_semantics<parallel>, #tpu.dimension_semantics<parallel>, #tpu.dimension_semantics<arbitrary>], iteration_bounds = array<i64: 1, 1, 1>, scalar_prefetch = 0 : i64, scratch_operands = 1 : i64, tpu.core_type = #tpu.core_type<tc>, window_params = [{transform_indices = @transform_0, window_bounds = array<i64: 128, 128>}, {transform_indices = @transform_1, window_bounds = array<i64: 128, 128>}, {transform_indices = @transform_2, window_bounds = array<i64: 128, 128>}]} {
    %c0_i32 = arith.constant 0 : i32
    %0 = arith.cmpi eq, %arg2, %c0_i32 : i32
    %1 = arith.extui %0 : i1 to i32
    %c0_i32_0 = arith.constant 0 : i32
    %2 = arith.cmpi ne, %1, %c0_i32_0 : i32
    scf.if %2 {
      %cst_10 = arith.constant 0.000000e+00 : f32
      %12 = vector.broadcast %cst_10 : f32 to vector<128x128xf32>
      %c0_11 = arith.constant 0 : index
      %c0_12 = arith.constant 0 : index
      %13 = vector.load %arg6[%c0_11, %c0_12] : memref<128x128xf32, #tpu.memory_space<vmem>>, vector<128x128xf32>
      tpu.vector_store %arg6[%c0_11, %c0_12], %12 {strides = array<i32>} : memref<128x128xf32, #tpu.memory_space<vmem>>, vector<128x128xf32>,
    } else {
    }
    %c0 = arith.constant 0 : index
    %c0_1 = arith.constant 0 : index
    %3 = vector.load %arg6[%c0, %c0_1] : memref<128x128xf32, #tpu.memory_space<vmem>>, vector<128x128xf32>
    %c0_2 = arith.constant 0 : index
    %c0_3 = arith.constant 0 : index
    %4 = vector.load %arg3[%c0_2, %c0_3] : memref<128x128xf32, #tpu.memory_space<vmem>>, vector<128x128xf32>
    %c0_4 = arith.constant 0 : index
    %c0_5 = arith.constant 0 : index
    %5 = vector.load %arg4[%c0_4, %c0_5] : memref<128x128xf32, #tpu.memory_space<vmem>>, vector<128x128xf32>
    %cst = arith.constant dense<0.000000e+00> : vector<128x128xf32>
    %6 = tpu.matmul %4, %5, %cst {dimension_numbers = #tpu.dot_dimension_numbers<[1], [0], [0], [1], [0, 0, 1, 1], [], []>} : vector<128x128xf32>, vector<128x128xf32>, vector<128x128xf32> -> vector<128x128xf32>
    %7 = arith.addf %3, %6 : vector<128x128xf32>
    %c0_6 = arith.constant 0 : index
    %c0_7 = arith.constant 0 : index
    %8 = vector.load %arg6[%c0_6, %c0_7] : memref<128x128xf32, #tpu.memory_space<vmem>>, vector<128x128xf32>
    tpu.vector_store %arg6[%c0_6, %c0_7], %7 {strides = array<i32>} : memref<128x128xf32, #tpu.memory_space<vmem>>, vector<128x128xf32>,
    %c0_i32_8 = arith.constant 0 : i32
    %9 = arith.cmpi eq, %arg2, %c0_i32_8 : i32
    %10 = arith.extui %9 : i1 to i32
    %c0_i32_9 = arith.constant 0 : i32
    %11 = arith.cmpi ne, %10, %c0_i32_9 : i32
    scf.if %11 {
      %c0_10 = arith.constant 0 : index
      %c0_11 = arith.constant 0 : index
      %12 = vector.load %arg6[%c0_10, %c0_11] : memref<128x128xf32, #tpu.memory_space<vmem>>, vector<128x128xf32>
      %cst_12 = arith.constant 0.000000e+00 : f32
      %13 = vector.broadcast %cst_12 : f32 to vector<128x128xf32>
      %14 = arith.maximumf %12, %13 : vector<128x128xf32>
      %c0_13 = arith.constant 0 : index
      %c0_14 = arith.constant 0 : index
      %15 = vector.load %arg5[%c0_13, %c0_14] : memref<128x128xf32, #tpu.memory_space<vmem>>, vector<128x128xf32>
      tpu.vector_store %arg5[%c0_13, %c0_14], %14 {strides = array<i32>} : memref<128x128xf32, #tpu.memory_space<vmem>>, vector<128x128xf32>,
    } else {
    }
    return
  }
  func.func @transform_0(%arg0: i32, %arg1: i32, %arg2: i32) -> (i32, i32) {
    %c0_i32 = arith.constant 0 : i32
    return %arg0, %arg2 : i32, i32
  }
  func.func @transform_1(%arg0: i32, %arg1: i32, %arg2: i32) -> (i32, i32) {
    %c0_i32 = arith.constant 0 : i32
    return %arg2, %arg1 : i32, i32
  }
  func.func @transform_2(%arg0: i32, %arg1: i32, %arg2: i32) -> (i32, i32) {
    %c0_i32 = arith.constant 0 : i32
    return %arg0, %arg1 : i32, i32
  }
}

</mosaic_0001>

<bundles_post_ra>
// kernel: graph_convolution.3
= control target key start
LH: loop header
LB: loop body
LE: loop exit
PB: predicated region body
PF: predicated region fallthrough
CT: control target
= control target key end

     0   :  { %s590_s1 = inlined_call_operand.vmem [shape: f32[128,128], index: 1, kind: input, shape index: {}]   ;;  %s591_s0 = inlined_call_operand.vmem [shape: f32[128,128], index: 0, kind: input, shape index: {}]   ;;  %s592_s2 = inlined_call_operand.vmem [shape: f32[128,128], index: 2, kind: output, shape index: {}]  }
   0x1   :  { %v78_v0 = vld [vmem:[%s590_s1 + $0x78] sm:$0xff]  ;;  %v77_v1 = vld [vmem:[%s590_s1 + $0x70] sm:$0xff]  ;;  %v76_v2 = vld [vmem:[%s590_s1 + $0x68] sm:$0xff] }
   0x2   :  { %343 = vmatprep.subr.mxu0 %v78_v0  ;;  %399 = vmatprep.subr.mxu1 %v78_v0  ;;  %v75_v3 = vld [vmem:[%s590_s1 + $0x60] sm:$0xff]  ;;  %v74_v4 = vld [vmem:[%s590_s1 + $0x58] sm:$0xff]  ;;  %v73_v5 = vld [vmem:[%s590_s1 + $0x50] sm:$0xff] }
   0x3   :  { %344 = vmatpush3.msra.mxu0 %v78_v0  ;;  %415 = vmatpush3.msra.mxu1 %v78_v0  ;;  %v72_v6 = vld [vmem:[%s590_s1 + $0x48] sm:$0xff]  ;;  %v71_v7 = vld [vmem:[%s590_s1 + $0x40] sm:$0xff]  ;;  %v70_v8 = vld [vmem:[%s590_s1 + $0x38] sm:$0xff] }
   0x4   :  { %345 = vmatprep.subr.mxu0 %v77_v1  ;;  %400 = vmatprep.subr.mxu1 %v77_v1  ;;  %v69_v9 = vld [vmem:[%s590_s1 + $0x30] sm:$0xff]  ;;  %v68_v10 = vld [vmem:[%s590_s1 + $0x28] sm:$0xff]  ;;  %v67_v11 = vld [vmem:[%s590_s1 + $0x20] sm:$0xff] }
   0x5   :  { %346 = vmatpush3.msra.mxu0 %v77_v1  ;;  %416 = vmatpush3.msra.mxu1 %v77_v1  ;;  %v66_v12 = vld [vmem:[%s590_s1 + $0x18] sm:$0xff]  ;;  %v65_v13 = vld [vmem:[%s590_s1 + $0x10] sm:$0xff]  ;;  %v64_v14 = vld [vmem:[%s590_s1 + $0x8] sm:$0xff] }
   0x6   :  { %347 = vmatprep.subr.mxu0 %v76_v2  ;;  %401 = vmatprep.subr.mxu1 %v76_v2  ;;  %v63_v15 = vld [vmem:[%s590_s1] sm:$0xff]  ;;  %v48_v18 = vld [vmem:[%s591_s0 + $0x8] sm:$0xff]  ;;  %v49_v20 = vld [vmem:[%s591_s0 + $0x10] sm:$0xff] }
   0x7   :  { %348 = vmatpush3.msra.mxu0 %v76_v2  ;;  %417 = vmatpush3.msra.mxu1 %v76_v2  ;;  %v47_v16 = vld [vmem:[%s591_s0] sm:$0xff]  ;;  %v56_v19 = vld [vmem:[%s591_s0 + $0x48] sm:$0xff]  ;;  %v57_v21 = vld [vmem:[%s591_s0 + $0x50] sm:$0xff] }
   0x8   :  { %349 = vmatprep.subr.mxu0 %v75_v3  ;;  %402 = vmatprep.subr.mxu1 %v75_v3  ;;  %v55_v17 = vld [vmem:[%s591_s0 + $0x40] sm:$0xff]  ;;  %v50_v22 = vld [vmem:[%s591_s0 + $0x18] sm:$0xff]  ;;  %v52_v26 = vld [vmem:[%s591_s0 + $0x28] sm:$0xff] }
   0x9   :  { %350 = vmatpush3.msra.mxu0 %v75_v3  ;;  %418 = vmatpush3.msra.mxu1 %v75_v3  ;;  %v58_v23 = vld [vmem:[%s591_s0 + $0x58] sm:$0xff]  ;;  %v51_v24 = vld [vmem:[%s591_s0 + $0x20] sm:$0xff]  ;;  %v60_v27 = vld [vmem:[%s591_s0 + $0x68] sm:$0xff] }
   0xa   :  { %351 = vmatprep.subr.mxu0 %v74_v4  ;;  %403 = vmatprep.subr.mxu1 %v74_v4  ;;  %v59_v25 = vld [vmem:[%s591_s0 + $0x60] sm:$0xff]  ;;  %v53_v28 = vld [vmem:[%s591_s0 + $0x30] sm:$0xff]  ;;  %v54_v30 = vld [vmem:[%s591_s0 + $0x38] sm:$0xff] }
   0xb   :  { %352 = vmatpush3.msra.mxu0 %v74_v4  ;;  %419 = vmatpush3.msra.mxu1 %v74_v4  ;;  %v61_v29 = vld [vmem:[%s591_s0 + $0x70] sm:$0xff]  ;;  %v62_v31 = vld [vmem:[%s591_s0 + $0x78] sm:$0xff] }
   0xc   :  { %353 = vmatprep.subr.mxu0 %v73_v5  ;;  %404 = vmatprep.subr.mxu1 %v73_v5 }
   0xd   :  { %354 = vmatpush3.msra.mxu0 %v73_v5  ;;  %420 = vmatpush3.msra.mxu1 %v73_v5 }
   0xe   :  { %355 = vmatprep.subr.mxu0 %v72_v6  ;;  %405 = vmatprep.subr.mxu1 %v72_v6 }
   0xf   :  { %356 = vmatpush3.msra.mxu0 %v72_v6  ;;  %421 = vmatpush3.msra.mxu1 %v72_v6 }
  0x10   :  { %357 = vmatprep.subr.mxu0 %v71_v7  ;;  %406 = vmatprep.subr.mxu1 %v71_v7 }
  0x11   :  { %358 = vmatpush3.msra.mxu0 %v71_v7  ;;  %422 = vmatpush3.msra.mxu1 %v71_v7 }
  0x12   :  { %359 = vmatprep.subr.mxu0 %v70_v8  ;;  %407 = vmatprep.subr.mxu1 %v70_v8 }
  0x13   :  { %360 = vmatpush3.msra.mxu0 %v70_v8  ;;  %423 = vmatpush3.msra.mxu1 %v70_v8 }
  0x14   :  { %361 = vmatprep.subr.mxu0 %v69_v9  ;;  %408 = vmatprep.subr.mxu1 %v69_v9 }
  0x15   :  { %362 = vmatpush3.msra.mxu0 %v69_v9  ;;  %424 = vmatpush3.msra.mxu1 %v69_v9 }
  0x16   :  { %363 = vmatprep.subr.mxu0 %v68_v10  ;;  %409 = vmatprep.subr.mxu1 %v68_v10 }
  0x17   :  { %364 = vmatpush3.msra.mxu0 %v68_v10  ;;  %425 = vmatpush3.msra.mxu1 %v68_v10 }
  0x18   :  { %365 = vmatprep.subr.mxu0 %v67_v11  ;;  %410 = vmatprep.subr.mxu1 %v67_v11 }
  0x19   :  { %366 = vmatpush3.msra.mxu0 %v67_v11  ;;  %426 = vmatpush3.msra.mxu1 %v67_v11 }
  0x1a   :  { %367 = vmatprep.subr.mxu0 %v66_v12  ;;  %411 = vmatprep.subr.mxu1 %v66_v12 }
  0x1b   :  { %368 = vmatpush3.msra.mxu0 %v66_v12  ;;  %427 = vmatpush3.msra.mxu1 %v66_v12 }
  0x1c   :  { %369 = vmatprep.subr.mxu0 %v65_v13  ;;  %412 = vmatprep.subr.mxu1 %v65_v13 }
  0x1d   :  { %370 = vmatpush3.msra.mxu0 %v65_v13  ;;  %428 = vmatpush3.msra.mxu1 %v65_v13 }
  0x1e   :  { %371 = vmatprep.subr.mxu0 %v64_v14  ;;  %413 = vmatprep.subr.mxu1 %v64_v14 }
  0x1f   :  { %372 = vmatpush3.msra.mxu0 %v64_v14  ;;  %429 = vmatpush3.msra.mxu1 %v64_v14 }
  0x20   :  { %373 = vmatprep.subr.mxu0 %v63_v15  ;;  %414 = vmatprep.subr.mxu1 %v63_v15 }
  0x21   :  { %374 = vmatpush3.msra.mxu0 %v63_v15  ;;  %430 = vmatpush3.msra.mxu1 %v63_v15 }
  0x22   :  { %375 = vmatprep.mubr.f32.mxu0 %v47_v16  ;;  %387 = vmatprep.mubr.f32.mxu1 %v55_v17 }
  0x23   :  { %376 = vmatmul.mubr.f32.vlgmr.msra.gmra.mxu0 %v48_v18  ;;  %388 = vmatmul.mubr.f32.vlgmr.msra.gmra.mxu1 %v56_v19 }
  0x24   :  { %378 = vmatprep.mubr.f32.mxu0 %v49_v20  ;;  %390 = vmatprep.mubr.f32.mxu1 %v57_v21 }
  0x27   :  { %379 = vmatmul.mubr.f32.gmra.mxu0 %v50_v22  ;;  %391 = vmatmul.mubr.f32.gmra.mxu1 %v58_v23 }
  0x28   :  { %381 = vmatprep.mubr.f32.mxu0 %v51_v24  ;;  %393 = vmatprep.mubr.f32.mxu1 %v59_v25 }
  0x2b   :  { %382 = vmatmul.mubr.f32.gmra.mxu0 %v52_v26  ;;  %394 = vmatmul.mubr.f32.gmra.mxu1 %v60_v27 }
  0x2c   :  { %384 = vmatprep.mubr.f32.mxu0 %v53_v28  ;;  %396 = vmatprep.mubr.f32.mxu1 %v61_v29 }
  0x2f   :  { %385 = vmatmul.mubr.f32.gmra.mxu0 %v54_v30  ;;  %397 = vmatmul.mubr.f32.gmra.mxu1 %v62_v31 }
  0xe3   :  { %v377_v32 = vpop.f32.mrf.mxu0  ;;  %v389_v33 = vpop.f32.mrf.mxu1 }
  0xe4   :  { %v276_v34 = vmax.f32 %v377_v32, 0.0  ;;  %v284_v35 = vmax.f32 %v389_v33, 0.0 }
  0xe5   :  { %v145_v36 = vpop.f32.mrf.mxu0  ;;  %v185_v37 = vpop.f32.mrf.mxu1 }
  0xe6   :  { %292 = vst [vmem:[%s592_s2 + $0x8] sm:$0xff] %v276_v34  ;;  %300 = vst [vmem:[%s592_s2 + $0x48] sm:$0xff] %v284_v35  ;;  %v275_v38 = vmax.f32 %v145_v36, 0.0  ;;  %v283_v39 = vmax.f32 %v185_v37, 0.0 }
  0xe7   :  { %v380_v40 = vpop.f32.mrf.mxu0  ;;  %v392_v41 = vpop.f32.mrf.mxu1 }
  0xe8   :  { %291 = vst [vmem:[%s592_s2] sm:$0xff] %v275_v38  ;;  %299 = vst [vmem:[%s592_s2 + $0x40] sm:$0xff] %v283_v39  ;;  %v278_v42 = vmax.f32 %v380_v40, 0.0  ;;  %v286_v43 = vmax.f32 %v392_v41, 0.0 }
  0xe9   :  { %v155_v44 = vpop.f32.mrf.mxu0  ;;  %v195_v45 = vpop.f32.mrf.mxu1 }
  0xea   :  { %294 = vst [vmem:[%s592_s2 + $0x18] sm:$0xff] %v278_v42  ;;  %302 = vst [vmem:[%s592_s2 + $0x58] sm:$0xff] %v286_v43  ;;  %v277_v46 = vmax.f32 %v155_v44, 0.0  ;;  %v285_v47 = vmax.f32 %v195_v45, 0.0 }
  0xeb   :  { %v383_v48 = vpop.f32.mrf.mxu0  ;;  %v395_v49 = vpop.f32.mrf.mxu1 }
  0xec   :  { %293 = vst [vmem:[%s592_s2 + $0x10] sm:$0xff] %v277_v46  ;;  %301 = vst [vmem:[%s592_s2 + $0x50] sm:$0xff] %v285_v47  ;;  %v280_v50 = vmax.f32 %v383_v48, 0.0  ;;  %v288_v51 = vmax.f32 %v395_v49, 0.0 }
  0xed   :  { %v165_v52 = vpop.f32.mrf.mxu0  ;;  %v205_v53 = vpop.f32.mrf.mxu1 }
  0xee   :  { %296 = vst [vmem:[%s592_s2 + $0x28] sm:$0xff] %v280_v50  ;;  %304 = vst [vmem:[%s592_s2 + $0x68] sm:$0xff] %v288_v51  ;;  %v279_v54 = vmax.f32 %v165_v52, 0.0  ;;  %v287_v55 = vmax.f32 %v205_v53, 0.0 }
  0xef   :  { %v386_v56 = vpop.f32.mrf.mxu0  ;;  %v398_v57 = vpop.f32.mrf.mxu1 }
  0xf0   :  { %295 = vst [vmem:[%s592_s2 + $0x20] sm:$0xff] %v279_v54  ;;  %303 = vst [vmem:[%s592_s2 + $0x60] sm:$0xff] %v287_v55  ;;  %v282_v58 = vmax.f32 %v386_v56, 0.0  ;;  %v290_v59 = vmax.f32 %v398_v57, 0.0 }
  0xf1   :  { %v175_v60 = vpop.f32.mrf.mxu0  ;;  %v215_v61 = vpop.f32.mrf.mxu1 }
  0xf2   :  { %298 = vst [vmem:[%s592_s2 + $0x38] sm:$0xff] %v282_v58  ;;  %306 = vst [vmem:[%s592_s2 + $0x78] sm:$0xff] %v290_v59  ;;  %v281_v62 = vmax.f32 %v175_v60, 0.0  ;;  %v289_v63 = vmax.f32 %v215_v61, 0.0 }
  0xf4   :  { %297 = vst [vmem:[%s592_s2 + $0x30] sm:$0xff] %v281_v62  ;;  %305 = vst [vmem:[%s592_s2 + $0x70] sm:$0xff] %v289_v63 }

// kernel: graph_convolution.2
= control target key start
LH: loop header
LB: loop body
LE: loop exit
PB: predicated region body
PF: predicated region fallthrough
CT: control target
= control target key end

     0   :  { %s574_s1 = inlined_call_operand.vmem [shape: f32[128,128], index: 1, kind: input, shape index: {}]   ;;  %s575_s0 = inlined_call_operand.vmem [shape: f32[128,128], index: 0, kind: input, shape index: {}]   ;;  %s576_s2 = inlined_call_operand.vmem [shape: f32[128,128], index: 2, kind: output, shape index: {}]  }
   0x1   :  { %v78_v0 = vld [vmem:[%s574_s1 + $0x78] sm:$0xff]  ;;  %v77_v1 = vld [vmem:[%s574_s1 + $0x70] sm:$0xff]  ;;  %v76_v2 = vld [vmem:[%s574_s1 + $0x68] sm:$0xff] }
   0x2   :  { %327 = vmatprep.subr.mxu0 %v78_v0  ;;  %383 = vmatprep.subr.mxu1 %v78_v0  ;;  %v75_v3 = vld [vmem:[%s574_s1 + $0x60] sm:$0xff]  ;;  %v74_v4 = vld [vmem:[%s574_s1 + $0x58] sm:$0xff]  ;;  %v73_v5 = vld [vmem:[%s574_s1 + $0x50] sm:$0xff] }
   0x3   :  { %328 = vmatpush3.msra.mxu0 %v78_v0  ;;  %399 = vmatpush3.msra.mxu1 %v78_v0  ;;  %v72_v6 = vld [vmem:[%s574_s1 + $0x48] sm:$0xff]  ;;  %v71_v7 = vld [vmem:[%s574_s1 + $0x40] sm:$0xff]  ;;  %v70_v8 = vld [vmem:[%s574_s1 + $0x38] sm:$0xff] }
   0x4   :  { %329 = vmatprep.subr.mxu0 %v77_v1  ;;  %384 = vmatprep.subr.mxu1 %v77_v1  ;;  %v69_v9 = vld [vmem:[%s574_s1 + $0x30] sm:$0xff]  ;;  %v68_v10 = vld [vmem:[%s574_s1 + $0x28] sm:$0xff]  ;;  %v67_v11 = vld [vmem:[%s574_s1 + $0x20] sm:$0xff] }
   0x5   :  { %330 = vmatpush3.msra.mxu0 %v77_v1  ;;  %400 = vmatpush3.msra.mxu1 %v77_v1  ;;  %v66_v12 = vld [vmem:[%s574_s1 + $0x18] sm:$0xff]  ;;  %v65_v13 = vld [vmem:[%s574_s1 + $0x10] sm:$0xff]  ;;  %v64_v14 = vld [vmem:[%s574_s1 + $0x8] sm:$0xff] }
   0x6   :  { %331 = vmatprep.subr.mxu0 %v76_v2  ;;  %385 = vmatprep.subr.mxu1 %v76_v2  ;;  %v63_v15 = vld [vmem:[%s574_s1] sm:$0xff]  ;;  %v48_v18 = vld [vmem:[%s575_s0 + $0x8] sm:$0xff]  ;;  %v49_v20 = vld [vmem:[%s575_s0 + $0x10] sm:$0xff] }
   0x7   :  { %332 = vmatpush3.msra.mxu0 %v76_v2  ;;  %401 = vmatpush3.msra.mxu1 %v76_v2  ;;  %v47_v16 = vld [vmem:[%s575_s0] sm:$0xff]  ;;  %v56_v19 = vld [vmem:[%s575_s0 + $0x48] sm:$0xff]  ;;  %v57_v21 = vld [vmem:[%s575_s0 + $0x50] sm:$0xff] }
   0x8   :  { %333 = vmatprep.subr.mxu0 %v75_v3  ;;  %386 = vmatprep.subr.mxu1 %v75_v3  ;;  %v55_v17 = vld [vmem:[%s575_s0 + $0x40] sm:$0xff]  ;;  %v50_v22 = vld [vmem:[%s575_s0 + $0x18] sm:$0xff]  ;;  %v52_v26 = vld [vmem:[%s575_s0 + $0x28] sm:$0xff] }
   0x9   :  { %334 = vmatpush3.msra.mxu0 %v75_v3  ;;  %402 = vmatpush3.msra.mxu1 %v75_v3  ;;  %v58_v23 = vld [vmem:[%s575_s0 + $0x58] sm:$0xff]  ;;  %v51_v24 = vld [vmem:[%s575_s0 + $0x20] sm:$0xff]  ;;  %v60_v27 = vld [vmem:[%s575_s0 + $0x68] sm:$0xff] }
   0xa   :  { %335 = vmatprep.subr.mxu0 %v74_v4  ;;  %387 = vmatprep.subr.mxu1 %v74_v4  ;;  %v59_v25 = vld [vmem:[%s575_s0 + $0x60] sm:$0xff]  ;;  %v53_v28 = vld [vmem:[%s575_s0 + $0x30] sm:$0xff]  ;;  %v54_v30 = vld [vmem:[%s575_s0 + $0x38] sm:$0xff] }
   0xb   :  { %336 = vmatpush3.msra.mxu0 %v74_v4  ;;  %403 = vmatpush3.msra.mxu1 %v74_v4  ;;  %v61_v29 = vld [vmem:[%s575_s0 + $0x70] sm:$0xff]  ;;  %v62_v31 = vld [vmem:[%s575_s0 + $0x78] sm:$0xff] }
   0xc   :  { %337 = vmatprep.subr.mxu0 %v73_v5  ;;  %388 = vmatprep.subr.mxu1 %v73_v5 }
   0xd   :  { %338 = vmatpush3.msra.mxu0 %v73_v5  ;;  %404 = vmatpush3.msra.mxu1 %v73_v5 }
   0xe   :  { %339 = vmatprep.subr.mxu0 %v72_v6  ;;  %389 = vmatprep.subr.mxu1 %v72_v6 }
   0xf   :  { %340 = vmatpush3.msra.mxu0 %v72_v6  ;;  %405 = vmatpush3.msra.mxu1 %v72_v6 }
  0x10   :  { %341 = vmatprep.subr.mxu0 %v71_v7  ;;  %390 = vmatprep.subr.mxu1 %v71_v7 }
  0x11   :  { %342 = vmatpush3.msra.mxu0 %v71_v7  ;;  %406 = vmatpush3.msra.mxu1 %v71_v7 }
  0x12   :  { %343 = vmatprep.subr.mxu0 %v70_v8  ;;  %391 = vmatprep.subr.mxu1 %v70_v8 }
  0x13   :  { %344 = vmatpush3.msra.mxu0 %v70_v8  ;;  %407 = vmatpush3.msra.mxu1 %v70_v8 }
  0x14   :  { %345 = vmatprep.subr.mxu0 %v69_v9  ;;  %392 = vmatprep.subr.mxu1 %v69_v9 }
  0x15   :  { %346 = vmatpush3.msra.mxu0 %v69_v9  ;;  %408 = vmatpush3.msra.mxu1 %v69_v9 }
  0x16   :  { %347 = vmatprep.subr.mxu0 %v68_v10  ;;  %393 = vmatprep.subr.mxu1 %v68_v10 }
  0x17   :  { %348 = vmatpush3.msra.mxu0 %v68_v10  ;;  %409 = vmatpush3.msra.mxu1 %v68_v10 }
  0x18   :  { %349 = vmatprep.subr.mxu0 %v67_v11  ;;  %394 = vmatprep.subr.mxu1 %v67_v11 }
  0x19   :  { %350 = vmatpush3.msra.mxu0 %v67_v11  ;;  %410 = vmatpush3.msra.mxu1 %v67_v11 }
  0x1a   :  { %351 = vmatprep.subr.mxu0 %v66_v12  ;;  %395 = vmatprep.subr.mxu1 %v66_v12 }
  0x1b   :  { %352 = vmatpush3.msra.mxu0 %v66_v12  ;;  %411 = vmatpush3.msra.mxu1 %v66_v12 }
  0x1c   :  { %353 = vmatprep.subr.mxu0 %v65_v13  ;;  %396 = vmatprep.subr.mxu1 %v65_v13 }
  0x1d   :  { %354 = vmatpush3.msra.mxu0 %v65_v13  ;;  %412 = vmatpush3.msra.mxu1 %v65_v13 }
  0x1e   :  { %355 = vmatprep.subr.mxu0 %v64_v14  ;;  %397 = vmatprep.subr.mxu1 %v64_v14 }
  0x1f   :  { %356 = vmatpush3.msra.mxu0 %v64_v14  ;;  %413 = vmatpush3.msra.mxu1 %v64_v14 }
  0x20   :  { %357 = vmatprep.subr.mxu0 %v63_v15  ;;  %398 = vmatprep.subr.mxu1 %v63_v15 }
  0x21   :  { %358 = vmatpush3.msra.mxu0 %v63_v15  ;;  %414 = vmatpush3.msra.mxu1 %v63_v15 }
  0x22   :  { %359 = vmatprep.mubr.f32.mxu0 %v47_v16  ;;  %371 = vmatprep.mubr.f32.mxu1 %v55_v17 }
  0x23   :  { %360 = vmatmul.mubr.f32.vlgmr.msra.gmra.mxu0 %v48_v18  ;;  %372 = vmatmul.mubr.f32.vlgmr.msra.gmra.mxu1 %v56_v19 }
  0x24   :  { %362 = vmatprep.mubr.f32.mxu0 %v49_v20  ;;  %374 = vmatprep.mubr.f32.mxu1 %v57_v21 }
  0x27   :  { %363 = vmatmul.mubr.f32.gmra.mxu0 %v50_v22  ;;  %375 = vmatmul.mubr.f32.gmra.mxu1 %v58_v23 }
  0x28   :  { %365 = vmatprep.mubr.f32.mxu0 %v51_v24  ;;  %377 = vmatprep.mubr.f32.mxu1 %v59_v25 }
  0x2b   :  { %366 = vmatmul.mubr.f32.gmra.mxu0 %v52_v26  ;;  %378 = vmatmul.mubr.f32.gmra.mxu1 %v60_v27 }
  0x2c   :  { %368 = vmatprep.mubr.f32.mxu0 %v53_v28  ;;  %380 = vmatprep.mubr.f32.mxu1 %v61_v29 }
  0x2f   :  { %369 = vmatmul.mubr.f32.gmra.mxu0 %v54_v30  ;;  %381 = vmatmul.mubr.f32.gmra.mxu1 %v62_v31 }
  0xe3   :  { %v361_v32 = vpop.f32.mrf.mxu0  ;;  %v373_v33 = vpop.f32.mrf.mxu1 }
  0xe4   :  { %276 = vst [vmem:[%s576_s2 + $0x8] sm:$0xff] %v361_v32  ;;  %284 = vst [vmem:[%s576_s2 + $0x48] sm:$0xff] %v373_v33 }
  0xe5   :  { %v145_v34 = vpop.f32.mrf.mxu0  ;;  %v185_v35 = vpop.f32.mrf.mxu1 }
  0xe6   :  { %275 = vst [vmem:[%s576_s2] sm:$0xff] %v145_v34  ;;  %283 = vst [vmem:[%s576_s2 + $0x40] sm:$0xff] %v185_v35 }
  0xe7   :  { %v364_v36 = vpop.f32.mrf.mxu0  ;;  %v376_v37 = vpop.f32.mrf.mxu1 }
  0xe8   :  { %278 = vst [vmem:[%s576_s2 + $0x18] sm:$0xff] %v364_v36  ;;  %286 = vst [vmem:[%s576_s2 + $0x58] sm:$0xff] %v376_v37 }
  0xe9   :  { %v155_v38 = vpop.f32.mrf.mxu0  ;;  %v195_v39 = vpop.f32.mrf.mxu1 }
  0xea   :  { %277 = vst [vmem:[%s576_s2 + $0x10] sm:$0xff] %v155_v38  ;;  %285 = vst [vmem:[%s576_s2 + $0x50] sm:$0xff] %v195_v39 }
  0xeb   :  { %v367_v40 = vpop.f32.mrf.mxu0  ;;  %v379_v41 = vpop.f32.mrf.mxu1 }
  0xec   :  { %280 = vst [vmem:[%s576_s2 + $0x28] sm:$0xff] %v367_v40  ;;  %288 = vst [vmem:[%s576_s2 + $0x68] sm:$0xff] %v379_v41 }
  0xed   :  { %v165_v42 = vpop.f32.mrf.mxu0  ;;  %v205_v43 = vpop.f32.mrf.mxu1 }
  0xee   :  { %279 = vst [vmem:[%s576_s2 + $0x20] sm:$0xff] %v165_v42  ;;  %287 = vst [vmem:[%s576_s2 + $0x60] sm:$0xff] %v205_v43 }
  0xef   :  { %v370_v44 = vpop.f32.mrf.mxu0  ;;  %v382_v45 = vpop.f32.mrf.mxu1 }
  0xf0   :  { %282 = vst [vmem:[%s576_s2 + $0x38] sm:$0xff] %v370_v44  ;;  %290 = vst [vmem:[%s576_s2 + $0x78] sm:$0xff] %v382_v45 }
  0xf1   :  { %v175_v46 = vpop.f32.mrf.mxu0  ;;  %v215_v47 = vpop.f32.mrf.mxu1 }
  0xf2   :  { %281 = vst [vmem:[%s576_s2 + $0x30] sm:$0xff] %v175_v46  ;;  %289 = vst [vmem:[%s576_s2 + $0x70] sm:$0xff] %v215_v47 }

</bundles_post_ra>
